<compile_context>
chip_gen: v7x
topology: tpu7x:2x2x1
jax: 0.10.0
libtpu: 0.0.40
codegen_flags: <defaults>
</compile_context>

<pallas_src>
import functools
import numpy as np
import jax
import jax.numpy as jnp
from jax.experimental import pallas as pl
from jax.experimental.pallas import tpu as pltpu

NEG_SLOPE = 0.2          # LeakyReLU slope of the PiGAN mapping network
FIRST_OMEGA = 600.0      # first_omega_0
HIDDEN_OMEGA = 30.0      # hidden_omega_0


def _round_up(x, m):
    return ((x + m - 1) // m) * m


# ----------------------------- mapping-network kernel (runs once per batch) -----------------------------

def _pigan_mapping_kernel(*refs, n_map, neg_slope, first_omega, hidden_omega):
    """Inputs: z (Bp, Z) f32, (n_map+1) mapping (w, b) pairs f32.
       Outputs: gamma_first (Bp, H), gamma_hidden (Bp, H), beta (Bp, H), all f32."""
    gf_ref, gh_ref, bt_ref = refs[-3:]
    it = iter(refs[:-3])
    z_ref = next(it)
    wb = [(next(it), next(it)) for _ in range(n_map + 1)]

    f32 = jnp.float32
    h = z_ref[...]
    for (w_r, b_r) in wb[:-1]:
        y = jnp.dot(h, w_r[...], preferred_element_type=f32) + b_r[...]
        h = jnp.where(y > 0, y, neg_slope * y)
    w_r, b_r = wb[-1]
    gb = jnp.dot(h, w_r[...], preferred_element_type=f32) + b_r[...]      # (Bp, 2H)
    H = gb.shape[-1] // 2
    gamma = gb[:, :H]
    beta = gb[:, H:]
    # Hoist (gamma + omega) once per batch — the SIREN layers reuse these directly.
    gf_ref[...] = gamma + first_omega
    gh_ref[...] = gamma + hidden_omega
    bt_ref[...] = beta


# ----------------------------- FiLM-SIREN stack kernel (row-tiled grid) -----------------------------

def _pigan_inr_kernel(*refs, n_hidden):
    """Per grid cell (b, j):
       Inputs: x (1, TM, Din) f32; gamma_first/gamma_hidden/beta (1, 1, H) f32;
               first INR (w, b) f32; n_hidden INR (w bf16, b f32) pairs;
               last INR (w bf16 lane-padded, b f32 lane-padded).
       Output: o (1, TM, OUT) f32."""
    o_ref = refs[-1]
    it = iter(refs[:-1])
    x_ref, gf_ref, gh_ref, bt_ref = next(it), next(it), next(it), next(it)
    w1_ref, b1_ref = next(it), next(it)
    hid_wb = [(next(it), next(it)) for _ in range(n_hidden)]
    wl_ref, bl_ref = next(it), next(it)

    f32 = jnp.float32
    bf16 = jnp.bfloat16

    gf = gf_ref[0]        # (1, H), broadcasts over the TM rows
    gh = gh_ref[0]        # (1, H)
    bt = bt_ref[0]        # (1, H)

    # ---- first FiLM-SIREN layer (f32: omega_0 = 600 amplifies rounding; K = D_in is tiny) ----
    x0 = x_ref[0]         # (TM, Din)
    y = jnp.dot(x0, w1_ref[...], preferred_element_type=f32) + b1_ref[...]
    x = jnp.sin(gf * y + bt)

    # ---- hidden FiLM-SIREN layers (bf16 matmuls, f32 accumulation + epilogue) ----
    for (w_r, b_r) in hid_wb:
        y = jnp.dot(x.astype(bf16), w_r[...], preferred_element_type=f32) + b_r[...]
        x = jnp.sin(gh * y + bt)

    # ---- final layer: no FiLM, omega_0 = 1, activation 'none' (8-lane padded output) ----
    o_ref[0] = jnp.dot(x.astype(bf16), wl_ref[...], preferred_element_type=f32) + bl_ref[...]


# ----------------------------- wrapper -----------------------------

def pigan_forward_pallas(coords, z, params,
                         first_omega=FIRST_OMEGA, hidden_omega=HIDDEN_OMEGA):
    B, N, d_in = coords.shape
    if z.ndim == 3:
        z2 = z[:, 0, :]
    else:
        z2 = z
    Z = z2.shape[-1]

    map_wb = params["map"]
    w1, b1 = params["inr_first"]
    hid_wb = params["inr_hidden"]
    wl_p, bl_p = params["inr_last_padded"]      # built once at init time
    d_out = params["d_out"]
    H = w1.shape[1]
    OUT = wl_p.shape[1]

    # ---- stage 1: FiLM mapping network, once per batch (tiny gridless kernel) ----
    Bp = max(8, _round_up(B, 8))                # sublane-pad the batch rows
    z_pad = jnp.zeros((Bp, Z), jnp.float32).at[:B].set(z2.astype(jnp.float32))
    map_inputs = [z_pad]
    for (w, b) in map_wb:
        map_inputs += [w, b]

    gf, gh, bt = pl.pallas_call(
        functools.partial(
            _pigan_mapping_kernel,
            n_map=len(map_wb) - 1,
            neg_slope=NEG_SLOPE,
            first_omega=float(first_omega),
            hidden_omega=float(hidden_omega),
        ),
        out_shape=(
            jax.ShapeDtypeStruct((Bp, H), jnp.float32),
            jax.ShapeDtypeStruct((Bp, H), jnp.float32),
            jax.ShapeDtypeStruct((Bp, H), jnp.float32),
        ),
    )(*map_inputs)
    # Per-batch conditioning, shaped (B, 1, H) so the grid kernel can take (1, 1, H) blocks.
    gf = gf[:B].reshape(B, 1, H)
    gh = gh[:B].reshape(B, 1, H)
    bt = bt[:B].reshape(B, 1, H)

    # ---- stage 2: row-tiled FiLM-SIREN stack ----
    # TM >= 256 fills the MXU M dimension on v6e/v7x at realistic N; small N gets one tile.
    TM = 512 if N >= 512 else _round_up(N, 8)
    N_pad = _round_up(N, TM)
    if N_pad != N:
        coords_p = jnp.zeros((B, N_pad, d_in), coords.dtype).at[:, :N].set(coords)
    else:
        coords_p = coords

    grid = (B, N_pad // TM)

    in_specs = [
        pl.BlockSpec((1, TM, d_in), lambda b, j: (b, j, 0)),   # coordinates tile
        pl.BlockSpec((1, 1, H), lambda b, j: (b, 0, 0)),       # gamma + first_omega
        pl.BlockSpec((1, 1, H), lambda b, j: (b, 0, 0)),       # gamma + hidden_omega
        pl.BlockSpec((1, 1, H), lambda b, j: (b, 0, 0)),       # beta
        pl.BlockSpec(w1.shape, lambda b, j: (0, 0)),           # weights: constant block idx
        pl.BlockSpec(b1.shape, lambda b, j: (0, 0)),           #   -> VMEM-resident, no re-DMA
    ]
    inputs = [coords_p, gf, gh, bt, w1, b1]
    for (w, b) in hid_wb:
        in_specs += [pl.BlockSpec(w.shape, lambda b_, j_: (0, 0)),
                     pl.BlockSpec(b.shape, lambda b_, j_: (0, 0))]
        inputs += [w, b]
    in_specs += [pl.BlockSpec(wl_p.shape, lambda b, j: (0, 0)),
                 pl.BlockSpec(bl_p.shape, lambda b, j: (0, 0))]
    inputs += [wl_p, bl_p]

    out_spec = pl.BlockSpec((1, TM, OUT), lambda b, j: (b, j, 0))

    # VMEM budget: resident weights + double-buffered row tiles + activation scratch + margin.
    weight_bytes = sum(int(a.size) * a.dtype.itemsize for a in inputs[1:])
    tile_bytes = 2 * (TM * d_in * 4 + TM * OUT * 4)
    act_bytes = 8 * TM * H * 4
    vmem_est = weight_bytes * 2 + tile_bytes + act_bytes + (8 << 20)
    vmem_limit = int(min(64 << 20, max(32 << 20, vmem_est)))

    out = pl.pallas_call(
        functools.partial(_pigan_inr_kernel, n_hidden=len(hid_wb)),
        out_shape=jax.ShapeDtypeStruct((B, N_pad, OUT), jnp.float32),
        grid=grid,
        in_specs=in_specs,
        out_specs=out_spec,
        compiler_params=pltpu.CompilerParams(
            dimension_semantics=("parallel", "parallel"),
            vmem_limit_bytes=vmem_limit,
        ),
    )(*inputs)

    return out[:, :N, :d_out]


# ----------------------------- parameter init -----------------------------

def _kaiming_in_normal(key, fan_in, fan_out, a=0.2):
    gain = np.sqrt(2.0 / (1.0 + a * a))
    std = gain / np.sqrt(fan_in)
    return std * jax.random.normal(key, (fan_in, fan_out), dtype=jnp.float32)


def _default_bias(key, fan_in, fan_out):
    bound = 1.0 / np.sqrt(fan_in)
    return jax.random.uniform(key, (1, fan_out), jnp.float32, -bound, bound)


def init_params(key, d_in, d_out, z_size, hm, h, n_inr, n_map=3):
    ks = iter(jax.random.split(key, 64))
    p = {}

    # --- PiGANMappingNetwork: [Linear + LeakyReLU(0.2)] * n_map, then Linear(hm, 2h), last w *= 0.25 ---
    map_layers = []
    dims = [z_size] + [hm] * n_map
    for i in range(n_map):
        w = _kaiming_in_normal(next(ks), dims[i], dims[i + 1], a=0.2)
        b = _default_bias(next(ks), dims[i], dims[i + 1])
        map_layers.append((w, b))
    w_last = 0.25 * _kaiming_in_normal(next(ks), hm, 2 * h, a=0.2)
    b_last = _default_bias(next(ks), hm, 2 * h)
    map_layers.append((w_last, b_last))
    p["map"] = map_layers

    # --- first INR layer: 'siren_first' weights, 'polar' bias (f32, omega_0 = 600) ---
    w = jax.random.uniform(next(ks), (d_in, h), jnp.float32, -1.0 / d_in, 1.0 / d_in)
    b = jax.random.uniform(next(ks), (1, h), jnp.float32, 0.0, 2.0 * np.pi)
    p["inr_first"] = (w, b)

    # --- hidden INR layers: 'siren' weights (omega=30), 'polar' bias; weights stored bf16 for MXU ---
    hidden = []
    lim = np.sqrt(6.0 / h) / HIDDEN_OMEGA
    for _ in range(n_inr - 1):
        w = jax.random.uniform(next(ks), (h, h), jnp.float32, -lim, lim).astype(jnp.bfloat16)
        b = jax.random.uniform(next(ks), (1, h), jnp.float32, 0.0, 2.0 * np.pi)
        hidden.append((w, b))
    p["inr_hidden"] = hidden

    # --- last layer: 'siren_omega' (omega=30) weights, bias 'none' -> PyTorch default init ---
    w = jax.random.uniform(next(ks), (h, d_out), jnp.float32, -lim, lim)
    b = _default_bias(next(ks), h, d_out)
    out_pad = max(8, _round_up(d_out, 8))      # 8-lane padded store (built once, here)
    wl_p = jnp.zeros((h, out_pad), jnp.float32).at[:, :d_out].set(w).astype(jnp.bfloat16)
    bl_p = jnp.zeros((1, out_pad), jnp.float32).at[:, :d_out].set(b)
    p["inr_last"] = (w.astype(jnp.bfloat16), b)     # unpadded, for the reference
    p["inr_last_padded"] = (wl_p, bl_p)
    p["d_out"] = d_out
    return p


# ----------------------------- pure-JAX reference -----------------------------

def pigan_forward_ref(coords, z, params,
                      first_omega=FIRST_OMEGA, hidden_omega=HIDDEN_OMEGA):
    hp = jax.lax.Precision.HIGHEST
    f32 = jnp.float32
    h = z[:, 0, :]
    for (w, b) in params["map"][:-1]:
        y = jnp.dot(h, w, precision=hp) + b
        h = jnp.where(y > 0, y, NEG_SLOPE * y)
    w, b = params["map"][-1]
    gb = jnp.dot(h, w, precision=hp) + b
    H = gb.shape[-1] // 2
    gamma = gb[:, :H][:, None, :]
    beta = gb[:, H:][:, None, :]

    w, b = params["inr_first"]
    y = jnp.einsum("bnk,kh->bnh", coords, w, precision=hp) + b
    x = jnp.sin((gamma + first_omega) * y + beta)
    for (w, b) in params["inr_hidden"]:
        y = jnp.einsum("bnk,kh->bnh", x, w.astype(f32), precision=hp) + b
        x = jnp.sin((gamma + hidden_omega) * y + beta)
    w, b = params["inr_last"]
    return jnp.einsum("bnk,kh->bnh", x, w.astype(f32), precision=hp) + b


# ----------------------------- main -----------------------------

if __name__ == "__main__":
    B, N = 2, 64            # batch, number of coordinate points
    D_IN, D_OUT = 3, 3      # in_features / out_features
    Z, HM, H = 64, 64, 128  # z_size, mapping hidden, INR hidden (small but lane-friendly)
    L_INR = 4               # num_INR_layers (small): 1 first + 3 hidden + 1 final linear

    key = jax.random.PRNGKey(0)
    kc, kz, kp = jax.random.split(key, 3)
    coords = jax.random.uniform(kc, (B, N, D_IN), jnp.float32, -1.0, 1.0)
    z = jax.random.normal(kz, (B, 1, Z), jnp.float32)
    params = init_params(kp, D_IN, D_OUT, Z, HM, H, L_INR)

    out = pigan_forward_pallas(coords, z, params)
    out = jax.block_until_ready(out)

    ref = pigan_forward_ref(coords, z, params)
    assert out.shape == (B, N, D_OUT), out.shape
    err = float(jnp.max(jnp.abs(out - ref)))
    assert err < 5e-2, f"max abs err too large: {err}"
    print("KERNEL_OK")
</pallas_src>

<mosaic_0001>
module attributes {stable_mosaic.version = 11 : i64} {
  func.func @_pigan_mapping_kernel(%arg0: memref<8x64xf32, #tpu.memory_space<vmem>>, %arg1: memref<64x64xf32, #tpu.memory_space<vmem>>, %arg2: memref<1x64xf32, #tpu.memory_space<vmem>>, %arg3: memref<64x64xf32, #tpu.memory_space<vmem>>, %arg4: memref<1x64xf32, #tpu.memory_space<vmem>>, %arg5: memref<64x64xf32, #tpu.memory_space<vmem>>, %arg6: memref<1x64xf32, #tpu.memory_space<vmem>>, %arg7: memref<64x256xf32, #tpu.memory_space<vmem>>, %arg8: memref<1x256xf32, #tpu.memory_space<vmem>>, %arg9: memref<8x128xf32, #tpu.memory_space<vmem>>, %arg10: memref<8x128xf32, #tpu.memory_space<vmem>>, %arg11: memref<8x128xf32, #tpu.memory_space<vmem>>) attributes {dimension_semantics = [], scalar_prefetch = 0 : i64, scratch_operands = 0 : i64, tpu.core_type = #tpu.core_type<tc>} {
    %c0 = arith.constant 0 : index
    %c0_0 = arith.constant 0 : index
    %0 = vector.load %arg0[%c0, %c0_0] : memref<8x64xf32, #tpu.memory_space<vmem>>, vector<8x64xf32>
    %c0_1 = arith.constant 0 : index
    %c0_2 = arith.constant 0 : index
    %1 = vector.load %arg1[%c0_1, %c0_2] : memref<64x64xf32, #tpu.memory_space<vmem>>, vector<64x64xf32>
    %cst = arith.constant dense<0.000000e+00> : vector<8x64xf32>
    %2 = tpu.matmul %0, %1, %cst {dimension_numbers = #tpu.dot_dimension_numbers<[1], [0], [0], [1], [0, 0, 1, 1], [], []>} : vector<8x64xf32>, vector<64x64xf32>, vector<8x64xf32> -> vector<8x64xf32>
    %c0_3 = arith.constant 0 : index
    %c0_4 = arith.constant 0 : index
    %3 = vector.load %arg2[%c0_3, %c0_4] : memref<1x64xf32, #tpu.memory_space<vmem>>, vector<1x64xf32>
    %4 = vector.broadcast %3 : vector<1x64xf32> to vector<8x64xf32>
    %5 = arith.addf %2, %4 : vector<8x64xf32>
    %cst_5 = arith.constant 0.000000e+00 : f32
    %6 = vector.broadcast %cst_5 : f32 to vector<8x64xf32>
    %7 = arith.cmpf ogt, %5, %6 : vector<8x64xf32>
    %cst_6 = arith.constant 2.000000e-01 : f32
    %8 = vector.broadcast %cst_6 : f32 to vector<8x64xf32>
    %9 = arith.mulf %8, %5 : vector<8x64xf32>
    %10 = arith.select %7, %5, %9 : vector<8x64xi1>, vector<8x64xf32>
    %c0_7 = arith.constant 0 : index
    %c0_8 = arith.constant 0 : index
    %11 = vector.load %arg3[%c0_7, %c0_8] : memref<64x64xf32, #tpu.memory_space<vmem>>, vector<64x64xf32>
    %cst_9 = arith.constant dense<0.000000e+00> : vector<8x64xf32>
    %12 = tpu.matmul %10, %11, %cst_9 {dimension_numbers = #tpu.dot_dimension_numbers<[1], [0], [0], [1], [0, 0, 1, 1], [], []>} : vector<8x64xf32>, vector<64x64xf32>, vector<8x64xf32> -> vector<8x64xf32>
    %c0_10 = arith.constant 0 : index
    %c0_11 = arith.constant 0 : index
    %13 = vector.load %arg4[%c0_10, %c0_11] : memref<1x64xf32, #tpu.memory_space<vmem>>, vector<1x64xf32>
    %14 = vector.broadcast %13 : vector<1x64xf32> to vector<8x64xf32>
    %15 = arith.addf %12, %14 : vector<8x64xf32>
    %cst_12 = arith.constant 0.000000e+00 : f32
    %16 = vector.broadcast %cst_12 : f32 to vector<8x64xf32>
    %17 = arith.cmpf ogt, %15, %16 : vector<8x64xf32>
    %cst_13 = arith.constant 2.000000e-01 : f32
    %18 = vector.broadcast %cst_13 : f32 to vector<8x64xf32>
    %19 = arith.mulf %18, %15 : vector<8x64xf32>
    %20 = arith.select %17, %15, %19 : vector<8x64xi1>, vector<8x64xf32>
    %c0_14 = arith.constant 0 : index
    %c0_15 = arith.constant 0 : index
    %21 = vector.load %arg5[%c0_14, %c0_15] : memref<64x64xf32, #tpu.memory_space<vmem>>, vector<64x64xf32>
    %cst_16 = arith.constant dense<0.000000e+00> : vector<8x64xf32>
    %22 = tpu.matmul %20, %21, %cst_16 {dimension_numbers = #tpu.dot_dimension_numbers<[1], [0], [0], [1], [0, 0, 1, 1], [], []>} : vector<8x64xf32>, vector<64x64xf32>, vector<8x64xf32> -> vector<8x64xf32>
    %c0_17 = arith.constant 0 : index
    %c0_18 = arith.constant 0 : index
    %23 = vector.load %arg6[%c0_17, %c0_18] : memref<1x64xf32, #tpu.memory_space<vmem>>, vector<1x64xf32>
    %24 = vector.broadcast %23 : vector<1x64xf32> to vector<8x64xf32>
    %25 = arith.addf %22, %24 : vector<8x64xf32>
    %cst_19 = arith.constant 0.000000e+00 : f32
    %26 = vector.broadcast %cst_19 : f32 to vector<8x64xf32>
    %27 = arith.cmpf ogt, %25, %26 : vector<8x64xf32>
    %cst_20 = arith.constant 2.000000e-01 : f32
    %28 = vector.broadcast %cst_20 : f32 to vector<8x64xf32>
    %29 = arith.mulf %28, %25 : vector<8x64xf32>
    %30 = arith.select %27, %25, %29 : vector<8x64xi1>, vector<8x64xf32>
    %c0_21 = arith.constant 0 : index
    %c0_22 = arith.constant 0 : index
    %31 = vector.load %arg7[%c0_21, %c0_22] : memref<64x256xf32, #tpu.memory_space<vmem>>, vector<64x256xf32>
    %cst_23 = arith.constant dense<0.000000e+00> : vector<8x256xf32>
    %32 = tpu.matmul %30, %31, %cst_23 {dimension_numbers = #tpu.dot_dimension_numbers<[1], [0], [0], [1], [0, 0, 1, 1], [], []>} : vector<8x64xf32>, vector<64x256xf32>, vector<8x256xf32> -> vector<8x256xf32>
    %c0_24 = arith.constant 0 : index
    %c0_25 = arith.constant 0 : index
    %33 = vector.load %arg8[%c0_24, %c0_25] : memref<1x256xf32, #tpu.memory_space<vmem>>, vector<1x256xf32>
    %34 = vector.broadcast %33 : vector<1x256xf32> to vector<8x256xf32>
    %35 = arith.addf %32, %34 : vector<8x256xf32>
    %36 = vector.extract_strided_slice %35 {offsets = [0, 0], sizes = [8, 128], strides = [1, 1]} : vector<8x256xf32> to vector<8x128xf32>
    %37 = vector.extract_strided_slice %35 {offsets = [0, 128], sizes = [8, 128], strides = [1, 1]} : vector<8x256xf32> to vector<8x128xf32>
    %cst_26 = arith.constant 6.000000e+02 : f32
    %38 = vector.broadcast %cst_26 : f32 to vector<8x128xf32>
    %39 = arith.addf %36, %38 : vector<8x128xf32>
    %c0_27 = arith.constant 0 : index
    %c0_28 = arith.constant 0 : index
    %40 = vector.load %arg9[%c0_27, %c0_28] : memref<8x128xf32, #tpu.memory_space<vmem>>, vector<8x128xf32>
    tpu.vector_store %arg9[%c0_27, %c0_28], %39 {strides = array<i32>} : memref<8x128xf32, #tpu.memory_space<vmem>>, vector<8x128xf32>,
    %cst_29 = arith.constant 3.000000e+01 : f32
    %41 = vector.broadcast %cst_29 : f32 to vector<8x128xf32>
    %42 = arith.addf %36, %41 : vector<8x128xf32>
    %c0_30 = arith.constant 0 : index
    %c0_31 = arith.constant 0 : index
    %43 = vector.load %arg10[%c0_30, %c0_31] : memref<8x128xf32, #tpu.memory_space<vmem>>, vector<8x128xf32>
    tpu.vector_store %arg10[%c0_30, %c0_31], %42 {strides = array<i32>} : memref<8x128xf32, #tpu.memory_space<vmem>>, vector<8x128xf32>,
    %c0_32 = arith.constant 0 : index
    %c0_33 = arith.constant 0 : index
    %44 = vector.load %arg11[%c0_32, %c0_33] : memref<8x128xf32, #tpu.memory_space<vmem>>, vector<8x128xf32>
    tpu.vector_store %arg11[%c0_32, %c0_33], %37 {strides = array<i32>} : memref<8x128xf32, #tpu.memory_space<vmem>>, vector<8x128xf32>,
    return
  }
}

</mosaic_0001>

<bundles_post_ra>
// kernel: tpu_custom_call.1
= control target key start
LH: loop header
LB: loop body
LE: loop exit
PB: predicated region body
PF: predicated region fallthrough
CT: control target
= control target key end

     0   :  { %17 = vsyncpa [#allocation3], 0  ;;  %s1102_s0 = inlined_call_operand.hbm [shape: f32[8,64], index: 0, kind: input, shape index: {}]   ;;  %s1103_s1 = inlined_call_operand.hbm [shape: f32[64,64], index: 1, kind: input, shape index: {}]   ;;  %s1104_s2 = inlined_call_operand.vmem [shape: f32[1,64], index: 2, kind: input, shape index: {}]   ;;  %s1105_s3 = inlined_call_operand.hbm [shape: f32[64,64], index: 3, kind: input, shape index: {}]   ;;  %s1106_s4 = inlined_call_operand.vmem [shape: f32[1,64], index: 4, kind: input, shape index: {}]   ;;  %s1107_s5 = inlined_call_operand.hbm [shape: f32[64,64], index: 5, kind: input, shape index: {}]   ;;  %s1108_s6 = inlined_call_operand.vmem [shape: f32[1,64], index: 6, kind: input, shape index: {}]   ;;  %s1109_s7 = inlined_call_operand.hbm [shape: f32[64,256], index: 7, kind: input, shape index: {}]   ;;  %s1110_s8 = inlined_call_operand.vmem [shape: f32[1,256], index: 8, kind: input, shape index: {}]   ;;  %s1111_s9 = inlined_call_operand.hbm [shape: f32[8,128], index: 9, kind: output, shape index: {0}]   ;;  %s1112_s10 = inlined_call_operand.hbm [shape: f32[8,128], index: 10, kind: output, shape index: {1}]   ;;  %s1113_s11 = inlined_call_operand.hbm [shape: f32[8,128], index: 11, kind: output, shape index: {2}]  }
   0x1   :  { %18 = vsyncpa [#allocation6], 0 }
   0x2   :  { %19 = vsyncpa [#allocation9], 0 }
   0x3   :  { %20 = vsyncpa [#allocation4], 0 }
   0x4   :  { %21 = vsyncpa [#allocation13], 0  ;;  %s873_s17 = smov [#allocation5]   ;;  %s687_s21 = scalar_lea.hbm %s1103_s1, 1024 }
   0x5   :  { %s37_s18 = sshll.u32 %s873_s17, 4  ;;  %p688_p0 = scmp.ne.s32.totalorder %s1103_s1, %s687_s21  ;;  %s38_s18 = int_to_ptr.vmem [resolvable:$true] %s37_s18 }
   0x6   :  { %p691_p1 = scmp.lt.u32.totalorder %s687_s21, %s1103_s1 }
   0x8   :  { %p693_p2 = pnand %p691_p1, %p688_p0 }
   0xa   :  { %696 = shalt.err (!%p693_p2)
}
   0xb   :  { %s697_s26 = scalar_lea.vmem %s38_s18, 1024  ;;  %p702_p4 = scmp.lt.s32.totalorder %s38_s18, %s38_s18 }
   0xc   :  { %p698_p3 = scmp.ne.s32.totalorder %s38_s18, %s697_s26  ;;  %p703_p5 = scmp.lt.s32.totalorder %s697_s26, %s697_s26 }
   0xe   :  { %p704_p6 = por %p703_p5, %p702_p4 }
  0x10   :  { %p705_p7 = pnand %p704_p6, %p698_p3 }
  0x12   :  { %708 = shalt.err (!%p705_p7)
}
  0x13   :  { %s874_s27 = smov 128   ;;  %s875_s28 = smov 8  }
  0x14   :  { %43 = dma.hbm_to_vmem [thread:$0]  %s1103_s1, 1024, %s38_s18, [#allocation6], %s874_s27, %s874_s27, %s875_s28  }
  0x15   :  { %s876_s12 = smov [#allocation8]   ;;  %s877_s14 = smov [#allocation2]  }
  0x16   :  { %s65_s13 = sshll.u32 %s876_s12, 4  ;;  %s28_s15 = sshll.u32 %s877_s14, 4  ;;  %s66_s13 = int_to_ptr.vmem [resolvable:$true] %s65_s13  ;;  %s29_s15 = int_to_ptr.vmem [resolvable:$true] %s28_s15 }
  0x17   :  { %s709_s19 = scalar_lea.hbm %s1107_s5, 1024 }
  0x18   :  { %p710_p8 = scmp.ne.s32.totalorder %s1107_s5, %s709_s19  ;;  %p713_p9 = scmp.lt.u32.totalorder %s709_s19, %s1107_s5 }
  0x1a   :  { %p715_p10 = pnand %p713_p9, %p710_p8 }
  0x1c   :  { %718 = shalt.err (!%p715_p10)
}
  0x1d   :  { %s719_s1 = scalar_lea.vmem %s66_s13, 1024  ;;  %p724_p12 = scmp.lt.s32.totalorder %s66_s13, %s66_s13 }
  0x1e   :  { %p720_p11 = scmp.ne.s32.totalorder %s66_s13, %s719_s1  ;;  %p725_p13 = scmp.lt.s32.totalorder %s719_s1, %s719_s1 }
  0x20   :  { %p726_p0 = por %p725_p13, %p724_p12 }
  0x22   :  { %p727_p1 = pnand %p726_p0, %p720_p11 }
  0x24   :  { %730 = shalt.err (!%p727_p1)
}
  0x25   :  { %71 = dma.hbm_to_vmem [thread:$0]  %s1107_s5, 1024, %s66_s13, [#allocation9], %s874_s27, %s874_s27, %s875_s28  }
  0x26   :  { %s731_s29 = scalar_lea.hbm %s1102_s0, 128 }
  0x27   :  { %p732_p2 = scmp.ne.s32.totalorder %s1102_s0, %s731_s29  ;;  %p735_p3 = scmp.lt.u32.totalorder %s731_s29, %s1102_s0 }
  0x29   :  { %p737_p4 = pnand %p735_p3, %p732_p2 }
  0x2b   :  { %740 = shalt.err (!%p737_p4)
}
  0x2c   :  { %s741_s17 = scalar_lea.vmem %s29_s15, 128  ;;  %p746_p6 = scmp.lt.s32.totalorder %s29_s15, %s29_s15 }
  0x2d   :  { %p742_p5 = scmp.ne.s32.totalorder %s29_s15, %s741_s17  ;;  %p747_p7 = scmp.lt.s32.totalorder %s741_s17, %s741_s17 }
  0x2f   :  { %p748_p8 = por %p747_p7, %p746_p6 }
  0x31   :  { %p749_p9 = pnand %p748_p8, %p742_p5 }
  0x33   :  { %752 = shalt.err (!%p749_p9)
}
  0x34   :  { %31 = dma.hbm_to_vmem [thread:$0]  %s1102_s0, 128, %s29_s15, [#allocation3]  }
  0x35   :  { %s878_s19 = smov [#allocation7]   ;;  %s879_s21 = smov [#allocation10]  }
  0x36   :  { %s51_s20 = sshll.u32 %s878_s19, 4  ;;  %s79_s22 = sshll.u32 %s879_s21, 4  ;;  %s52_s20 = int_to_ptr.vmem [resolvable:$true] %s51_s20  ;;  %s80_s22 = int_to_ptr.vmem [resolvable:$true] %s79_s22 }
  0x37   :  { %s753_s18 = scalar_lea.hbm %s1105_s3, 1024 }
  0x38   :  { %p754_p10 = scmp.ne.s32.totalorder %s1105_s3, %s753_s18  ;;  %p757_p11 = scmp.lt.u32.totalorder %s753_s18, %s1105_s3 }
  0x3a   :  { %p759_p12 = pnand %p757_p11, %p754_p10 }
  0x3c   :  { %762 = shalt.err (!%p759_p12)
}
  0x3d   :  { %s763_s0 = scalar_lea.vmem %s52_s20, 1024  ;;  %p768_p0 = scmp.lt.s32.totalorder %s52_s20, %s52_s20 }
  0x3e   :  { %p764_p13 = scmp.ne.s32.totalorder %s52_s20, %s763_s0  ;;  %p769_p1 = scmp.lt.s32.totalorder %s763_s0, %s763_s0 }
  0x40   :  { %p770_p2 = por %p769_p1, %p768_p0 }
  0x42   :  { %p771_p3 = pnand %p770_p2, %p764_p13 }
  0x44   :  { %774 = shalt.err (!%p771_p3)
}
  0x45   :  { %57 = dma.hbm_to_vmem [thread:$0]  %s1105_s3, 1024, %s52_s20, [#allocation6], %s874_s27, %s874_s27, %s875_s28  }
  0x46   :  { %s775_s16 = scalar_lea.hbm %s1109_s7, 2048 }
  0x47   :  { %p776_p4 = scmp.ne.s32.totalorder %s1109_s7, %s775_s16  ;;  %p779_p5 = scmp.lt.u32.totalorder %s775_s16, %s1109_s7 }
  0x49   :  { %p781_p6 = pnand %p779_p5, %p776_p4 }
  0x4b   :  { %784 = shalt.err (!%p781_p6)
}
  0x4c   :  { %s785_s21 = scalar_lea.vmem %s80_s22, 2048  ;;  %p790_p8 = scmp.lt.s32.totalorder %s80_s22, %s80_s22 }
  0x4d   :  { %p786_p7 = scmp.ne.s32.totalorder %s80_s22, %s785_s21  ;;  %p791_p9 = scmp.lt.s32.totalorder %s785_s21, %s785_s21 }
  0x4f   :  { %p792_p10 = por %p791_p9, %p790_p8 }
  0x51   :  { %p793_p11 = pnand %p792_p10, %p786_p7 }
  0x53   :  { %796 = shalt.err (!%p793_p11)
}
  0x54   :  { %s880_s3 = smov 256   ;;  %s881_s27 = smov 16  }
  0x55   :  { %85 = dma.hbm_to_vmem [thread:$0]  %s1109_s7, 2048, %s80_s22, [#allocation9], %s880_s3, %s880_s3, %s881_s27  }
  0x56   :  { %863 = dma.done.wait [#allocation3], 128  }
  0x57   :  { %864 = vsyncadd [#allocation3], 4294967168 }
  0x58   :  { %865 = dma.done.wait [#allocation6], 2048  }
  0x59   :  { %866 = vsyncadd [#allocation6], 4294965248 }
  0x5a   :  { %867 = dma.done.wait [#allocation9], 3072  }
  0x5b   :  { %868 = vsyncadd [#allocation9], 4294964224  ;;  %v882_v0 = vmov 0.0|0.0   ;;  %vm883_vm0 = vmmov 0   ;;  %v884_v1 = vmov 0.0   ;;  %v104_v2 = vld [vmem:[#allocation5] sm:$0xff] }
  0x5c   :  { %620 = vmatprep.subr.bf16.mxu0 %v882_v0  ;;  %579 = vmatprep.mubr.msk.f32.mxu0 %vm883_vm0, %v884_v1  ;;  %v105_v3 = vld [vmem:[#allocation5 + $0x8] sm:$0xff]  ;;  %v106_v4 = vld [vmem:[#allocation5 + $0x10] sm:$0xff]  ;;  %v107_v6 = vld [vmem:[#allocation5 + $0x18] sm:$0xff]  ;;  %vm119_vm1 = vcmask 523264   ;;  %s886_s26 = smov [#allocation11]   ;;  %s887_s0 = smov [#allocation14]  }
  0x5d   :  { %632 = vmatprep.subr.bf16.mxu1 %v882_v0  ;;  %598 = vmatprep.mubr.msk.f32.mxu1 %vm883_vm0, %v884_v1  ;;  %v621_v5 = vpack.c.bf16 %v105_v3, %v104_v2  ;;  %v624_v7 = vpack.c.bf16 %v107_v6, %v106_v4  ;;  %v196_v8 = vld [vmem:[#allocation7] sm:$0xff]  ;;  %v197_v9 = vld [vmem:[#allocation7 + $0x8] sm:$0xff]  ;;  %v198_v10 = vld [vmem:[#allocation7 + $0x10] sm:$0xff]  ;;  %s491_s29 = sshll.u32 %s886_s26, 4  ;;  %s511_s15 = sshll.u32 %s887_s0, 4  ;;  %s1052_s29 = int_to_ptr.vmem [resolvable:$true] %s491_s29  ;;  %s1054_s15 = int_to_ptr.vmem [resolvable:$true] %s511_s15 }
  0x5e   :  { %v108_v11 = vld [vmem:[#allocation5 + $0x20] sm:$0xff]  ;;  %v109_v12 = vld [vmem:[#allocation5 + $0x28] sm:$0xff]  ;;  %v633_v13 = vpack.c.bf16 %v197_v9, %v196_v8  ;;  %v199_v14 = vld [vmem:[#allocation7 + $0x18] sm:$0xff] }
  0x5f   :  { %622 = vmatpush3.bf16.msra.mxu0 %v621_v5  ;;  %v636_v15 = vpack.c.bf16 %v199_v14, %v198_v10  ;;  %v627_v16 = vpack.c.bf16 %v109_v12, %v108_v11  ;;  %v200_v17 = vld [vmem:[#allocation7 + $0x20] sm:$0xff]  ;;  %v201_v18 = vld [vmem:[#allocation7 + $0x28] sm:$0xff]  ;;  %v110_v19 = vld [vmem:[#allocation5 + $0x30] sm:$0xff] }
  0x60   :  { %623 = vmatprep.subr.bf16.mxu0 %v882_v0  ;;  %634 = vmatpush3.bf16.msra.mxu1 %v633_v13  ;;  %v111_v20 = vld [vmem:[#allocation5 + $0x38] sm:$0xff]  ;;  %v639_v21 = vpack.c.bf16 %v201_v18, %v200_v17  ;;  %v202_v24 = vld [vmem:[#allocation7 + $0x30] sm:$0xff]  ;;  %v287_v27 = vld [vmem:[#allocation8] sm:$0xff]  ;;  %v396_v17 = vlaneseq }
  0x61   :  { %635 = vmatprep.subr.bf16.mxu1 %v882_v0  ;;  %v630_v22 = vpack.c.bf16 %v111_v20, %v110_v19  ;;  %v103_v23 = vld [vmem:[#allocation2] sm:$0xff]  ;;  %v288_v28 = vld [vmem:[#allocation8 + $0x8] sm:$0xff]  ;;  %v289_v29 = vld [vmem:[#allocation8 + $0x10] sm:$0xff] }
  0x62   :  { %v203_v25 = vld [vmem:[#allocation7 + $0x38] sm:$0xff]  ;;  %v645_v30 = vpack.c.bf16 %v288_v28, %v287_v27  ;;  %v291_v33 = vld [vmem:[#allocation8 + $0x20] sm:$0xff]  ;;  %v292_v34 = vld [vmem:[#allocation8 + $0x28] sm:$0xff]  ;;  %v397_v18 = vshrl.u32 %v396_v17, 7 }
  0x63   :  { %625 = vmatpush3.bf16.msra.mxu0 %v624_v7  ;;  %v642_v26 = vpack.c.bf16 %v203_v25, %v202_v24  ;;  %v290_v31 = vld [vmem:[#allocation8 + $0x18] sm:$0xff]  ;;  %v651_v35 = vpack.c.bf16 %v292_v34, %v291_v33  ;;  %v293_v42 = vld [vmem:[#allocation8 + $0x30] sm:$0xff]  ;;  %v379_v45 = vld [vmem:[#allocation10 + $0x8] sm:$0xff] }
  0x64   :  { %626 = vmatprep.subr.bf16.mxu0 %v882_v0  ;;  %637 = vmatpush3.bf16.msra.mxu1 %v636_v15  ;;  %v648_v32 = vpack.c.bf16 %v290_v31, %v289_v29  ;;  %v529_v36 = vld [vmem:[%s1104_s2] ss:$0 sm:$0xff]  ;;  %v378_v47 = vld [vmem:[#allocation10] sm:$0xff]  ;;  %v380_v49 = vld [vmem:[#allocation10 + $0x10] sm:$0xff]  ;;  %v398_v19 = vsub.s32 0, %v397_v18 }
  0x65   :  { %638 = vmatprep.subr.bf16.mxu1 %v882_v0  ;;  %v294_v43 = vld [vmem:[#allocation8 + $0x38] sm:$0xff]  ;;  %v383_v50 = vld [vmem:[#allocation10 + $0x28] sm:$0xff]  ;;  %v658_v52 = vpack.c.bf16 %v380_v49, %v378_v47  ;;  %v382_v54 = vld [vmem:[#allocation10 + $0x20] sm:$0xff] }
  0x66   :  { %v654_v44 = vpack.c.bf16 %v294_v43, %v293_v42  ;;  %v381_v46 = vld [vmem:[#allocation10 + $0x18] sm:$0xff]  ;;  %v384_v55 = vld [vmem:[#allocation10 + $0x30] sm:$0xff]  ;;  %v387_v56 = vld [vmem:[#allocation10 + $0x48] sm:$0xff] }
  0x67   :  { %628 = vmatpush3.bf16.msra.mxu0 %v627_v16  ;;  %v656_v48 = vpack.c.bf16 %v381_v46, %v379_v45  ;;  %v385_v51 = vld [vmem:[#allocation10 + $0x38] sm:$0xff]  ;;  %v662_v58 = vpack.c.bf16 %v384_v55, %v382_v54  ;;  %v386_v60 = vld [vmem:[#allocation10 + $0x40] sm:$0xff]  ;;  %v388_v61 = vld [vmem:[#allocation10 + $0x50] sm:$0xff] }
  0x68   :  { %629 = vmatprep.subr.bf16.mxu0 %v882_v0  ;;  %640 = vmatpush3.bf16.msra.mxu1 %v639_v21  ;;  %v660_v53 = vpack.c.bf16 %v385_v51, %v383_v50  ;;  %v389_v57 = vld [vmem:[#allocation10 + $0x58] sm:$0xff]  ;;  %v666_v62 = vpack.c.bf16 %v388_v61, %v386_v60  ;;  %v391_v5 = vld [vmem:[#allocation10 + $0x68] sm:$0xff]  ;;  %v390_v8 = vld [vmem:[#allocation10 + $0x60] sm:$0xff]  ;;  %v402_v21 = vsub.s32 1, %v397_v18 }
  0x69   :  { %641 = vmatprep.subr.bf16.mxu1 %v882_v0  ;;  %v664_v59 = vpack.c.bf16 %v389_v57, %v387_v56  ;;  %v531_v63 = vld [vmem:[%s1106_s4] ss:$0 sm:$0xff]  ;;  %v392_v9 = vld [vmem:[#allocation10 + $0x70] sm:$0xff] }
  0x6a   :  { %v393_v6 = vld [vmem:[#allocation10 + $0x78] sm:$0xff]  ;;  %v670_v10 = vpack.c.bf16 %v392_v9, %v390_v8 }
  0x6b   :  { %631 = vmatpush3.bf16.msra.mxu0 %v630_v22  ;;  %v668_v7 = vpack.c.bf16 %v393_v6, %v391_v5  ;;  %v533_v11 = vld [vmem:[%s1108_s6] ss:$0 sm:$0xff]  ;;  %s885_s6 = smov [#allocation12]  }
  0x6c   :  { %644 = vmatprep.subr.bf16.mxu0 %v882_v0  ;;  %643 = vmatpush3.bf16.msra.mxu1 %v642_v26  ;;  %v394_v20 = vld [vmem:[%s1110_s8] sm:$0x3]  ;;  %s501_s25 = sshll.u32 %s885_s6, 4  ;;  %s502_s25 = int_to_ptr.vmem [resolvable:$true] %s501_s25 }
  0x6d   :  { %657 = vmatprep.subr.bf16.mxu1 %v656_v48  ;;  %v399_v22 = vrot.slane %v394_v20, %v398_v19  ;;  %s797_s8 = scalar_lea.vmem %s502_s25, 128  ;;  %p802_p13 = scmp.lt.s32.totalorder %s502_s25, %s502_s25 }
  0x6e   :  { %580 = vmatmul.mubr.msk.f32.vlgmr.msra.gmra.mrb[0].mxu0 %vm119_vm1, %v103_v23  ;;  %v403_v23 = vrot.slane %v394_v20, %v402_v21  ;;  %p798_p12 = scmp.ne.s32.totalorder %s502_s25, %s797_s8  ;;  %p803_p0 = scmp.lt.s32.totalorder %s797_s8, %s797_s8 }
  0x6f   :  { %617 = vmatprep.mubr.msk.f32.mxu0 %vm883_vm0, %v884_v1  ;;  %646 = vmatpush3.bf16.msra.mxu0 %v645_v30 }
  0x70   :  { %647 = vmatprep.subr.bf16.mxu0 %v882_v0  ;;  %p804_p1 = por %p803_p0, %p802_p13 }
  0x72   :  { %p805_p2 = pnand %p804_p1, %p798_p12 }
  0x73   :  { %649 = vmatpush3.bf16.msra.mxu0 %v648_v32 }
  0x74   :  { %650 = vmatprep.subr.bf16.mxu0 %v882_v0 }
  0x77   :  { %652 = vmatpush3.bf16.msra.mxu0 %v651_v35 }
  0x78   :  { %653 = vmatprep.subr.bf16.mxu0 %v882_v0 }
  0x7b   :  { %655 = vmatpush3.bf16.msra.mxu0 %v654_v44 }
 0x141   :  { %v189_v37 = vpop.f32.mrb[0].mxu0 }
 0x142   :  { %v190_v38 = vadd.f32 %v529_v36, %v189_v37  ;;  %v581_v39 = vpop.f32.mrb[1].mxu0 }
 0x144   :  { %vm193_vm2 = vcmp.gt.f32.partialorder %v190_v38, 0.0  ;;  %v194_v40 = vmul.f32 0.2, %v190_v38 }
 0x146   :  { %v195_v41 = vsel %vm193_vm2, %v190_v38, %v194_v40 }
 0x147   :  { %599 = vmatmul.mubr.msk.f32.vlgmr.msra.gmra.mrb[0].mxu1 %vm119_vm1, %v195_v41 }
 0x148   :  { %473 = vmatprep.mubr.f32.mxu1 %v884_v1  ;;  %659 = vmatpush1.bf16.msra.mxu1 %v658_v52 }
 0x149   :  { %661 = vmatprep.subr.bf16.mxu1 %v660_v53 }
 0x14c   :  { %663 = vmatpush1.bf16.msra.mxu1 %v662_v58 }
 0x14d   :  { %665 = vmatprep.subr.bf16.mxu1 %v664_v59 }
 0x150   :  { %667 = vmatpush1.bf16.msra.mxu1 %v666_v62 }
 0x151   :  { %669 = vmatprep.subr.bf16.mxu1 %v668_v7 }
 0x154   :  { %671 = vmatpush1.bf16.msra.mxu1 %v670_v10 }
 0x21a   :  { %v280_v0 = vpop.f32.mrb[0].mxu1 }
 0x21b   :  { %v281_v1 = vadd.f32 %v531_v63, %v280_v0  ;;  %v600_v2 = vpop.f32.mrb[1].mxu1 }
 0x21d   :  { %vm284_vm3 = vcmp.gt.f32.partialorder %v281_v1, 0.0  ;;  %v285_v3 = vmul.f32 0.2, %v281_v1 }
 0x21f   :  { %v286_v4 = vsel %vm284_vm3, %v281_v1, %v285_v3 }
 0x220   :  { %618 = vmatmul.mubr.msk.f32.vlgmr.msra.gmra.mrb[2].mxu0 %vm119_vm1, %v286_v4 }
 0x2f3   :  { %v371_v12 = vpop.f32.mrb[2].mxu0 }
 0x2f4   :  { %v372_v13 = vadd.f32 %v533_v11, %v371_v12  ;;  %v619_v14 = vpop.f32.mrb[3].mxu0 }
 0x2f6   :  { %vm375_vm4 = vcmp.gt.f32.partialorder %v372_v13, 0.0  ;;  %v376_v15 = vmul.f32 0.2, %v372_v13 }
 0x2f8   :  { %v377_v16 = vsel %vm375_vm4, %v372_v13, %v376_v15 }
 0x2f9   :  { %535 = vmatmul.mubr.msk.f32.vlgmr.msra.gmra.mrb[2].mxu1 %vm119_vm1, %v377_v16 }
 0x3cc   :  { %v475_v24 = vpop.f32.mrb[2].mxu1 }
 0x3cd   :  { %v476_v25 = vadd.f32 %v475_v24, %v399_v22  ;;  %v477_v26 = vpop.f32.mrb[3].mxu1 }
 0x3ce   :  { %v478_v27 = vadd.f32 %v477_v26, %v403_v23 }
 0x3cf   :  { %v480_v28 = vadd.f32 600.0, %v476_v25  ;;  %v482_v29 = vadd.f32 30.0, %v476_v25 }
 0x3d0   :  { %484 = vst [vmem:[#allocation14] sm:$0xff] %v478_v27 }
 0x3d1   :  { %481 = vst [vmem:[#allocation11] sm:$0xff] %v480_v28  ;;  %483 = vst [vmem:[#allocation12] sm:$0xff] %v482_v29 }
 0x3d2   :  { %808 = shalt.err (!%p805_p2)
}
 0x3d3   :  { %s809_s14 = scalar_lea.hbm %s1112_s10, 128 }
 0x3d4   :  { %p810_p3 = scmp.ne.s32.totalorder %s1112_s10, %s809_s14  ;;  %p813_p4 = scmp.lt.u32.totalorder %s809_s14, %s1112_s10 }
 0x3d6   :  { %p815_p5 = pnand %p813_p4, %p810_p3 }
 0x3d8   :  { %818 = shalt.err (!%p815_p5)
}
 0x3d9   :  { %504 = dma.vmem_to_hbm [thread:$0]  %s502_s25, 128, %s1112_s10, [#allocation13]  }
 0x3da   :  { %s819_s3 = scalar_lea.vmem %s1052_s29, 128  ;;  %p824_p7 = scmp.lt.s32.totalorder %s1052_s29, %s1052_s29 }
 0x3db   :  { %p820_p6 = scmp.ne.s32.totalorder %s1052_s29, %s819_s3  ;;  %p825_p8 = scmp.lt.s32.totalorder %s819_s3, %s819_s3 }
 0x3dd   :  { %p826_p9 = por %p825_p8, %p824_p7 }
 0x3df   :  { %p827_p10 = pnand %p826_p9, %p820_p6 }
 0x3e1   :  { %830 = shalt.err (!%p827_p10)
}
 0x3e2   :  { %s831_s20 = scalar_lea.hbm %s1111_s9, 128 }
 0x3e3   :  { %p832_p11 = scmp.ne.s32.totalorder %s1111_s9, %s831_s20  ;;  %p835_p12 = scmp.lt.u32.totalorder %s831_s20, %s1111_s9 }
 0x3e5   :  { %p837_p13 = pnand %p835_p12, %p832_p11 }
 0x3e7   :  { %840 = shalt.err (!%p837_p13)
}
 0x3e8   :  { %494 = dma.vmem_to_hbm [thread:$0]  %s1052_s29, 128, %s1111_s9, [#allocation4]  }
 0x3e9   :  { %s841_s18 = scalar_lea.vmem %s1054_s15, 128  ;;  %p846_p1 = scmp.lt.s32.totalorder %s1054_s15, %s1054_s15 }
 0x3ea   :  { %p842_p0 = scmp.ne.s32.totalorder %s1054_s15, %s841_s18  ;;  %p847_p2 = scmp.lt.s32.totalorder %s841_s18, %s841_s18 }
 0x3ec   :  { %p848_p3 = por %p847_p2, %p846_p1 }
 0x3ee   :  { %p849_p4 = pnand %p848_p3, %p842_p0 }
 0x3f0   :  { %852 = shalt.err (!%p849_p4)
}
 0x3f1   :  { %s853_s6 = scalar_lea.hbm %s1113_s11, 128 }
 0x3f2   :  { %p854_p5 = scmp.ne.s32.totalorder %s1113_s11, %s853_s6  ;;  %p857_p6 = scmp.lt.u32.totalorder %s853_s6, %s1113_s11 }
 0x3f4   :  { %p859_p7 = pnand %p857_p6, %p854_p5 }
 0x3f6   :  { %862 = shalt.err (!%p859_p7)
}
 0x3f7   :  { %514 = dma.vmem_to_hbm [thread:$0]  %s1054_s15, 128, %s1113_s11, [#allocation13]  }
 0x3f8   :  { %869 = dma.done.wait [#allocation4], 128  }
 0x3f9   :  { %870 = vsyncadd [#allocation4], 4294967168 }
 0x3fa   :  { %871 = dma.done.wait [#allocation13], 256  }
 0x3fb   :  { %872 = vsyncadd [#allocation13], 4294967040 }
 0x3fc   :  { %524 = vsyncpa [#allocation3], 1 }
 0x3fd   :  { %525 = vsyncpa [#allocation6], 1 }
 0x3fe   :  { %526 = vsyncpa [#allocation9], 1 }
 0x3ff   :  { %527 = vsyncpa [#allocation4], 1 }
 0x400   :  { %528 = vsyncpa [#allocation13], 1 }

</bundles_post_ra>
